<compile_context>
chip_gen: v6e
topology: v6e:2x2x1
jax: 0.10.0
libtpu: 0.0.40
codegen_flags: <defaults>
</compile_context>

<pallas_src>
import functools

import jax
import jax.numpy as jnp
from jax.experimental import pallas as pl
from jax.experimental.pallas import tpu as pltpu


def _spatial_attention_kernel(params_ref, x_ref, o_ref, *, nb, channels):
    # params_ref: SMEM (3,) = [w_max, w_avg, bias] of Conv2d(2, 1, kernel_size=1)
    # x_ref / o_ref: VMEM (nb*channels, thw) row tile; row r = local batch
    # element r // channels, channel r % channels.
    w_max = params_ref[0]
    w_avg = params_ref[1]
    bias = params_ref[2]
    inv_c = 1.0 / channels

    x = x_ref[...]                         # native dtype; no full-tile f32 upcast
    thw = x.shape[-1]

    if channels % 8 == 0:
        # Second-minor dim is sublane-aligned: 3-D regroup is relayout-free.
        xg = x.reshape(nb, channels, thw)
        mx = jnp.max(xg, axis=1).astype(jnp.float32)              # (nb, thw)
        sm = jnp.sum(xg, axis=1, dtype=jnp.float32)               # (nb, thw)
        att = jnp.maximum(w_max * mx + w_avg * (sm * inv_c) + bias, 0.0)
        out = xg * att[:, None, :].astype(x.dtype)                # bcast over C
        o_ref[...] = out.reshape(nb * channels, thw).astype(o_ref.dtype)
    else:
        # channels not a multiple of 8: strided sublane reads per channel avoid
        # a padded (nb, C, thw) relayout copy of the data tile.
        mx = x_ref[pl.ds(0, nb, stride=channels), :]              # (nb, thw)
        sm = mx.astype(jnp.float32)
        for c in range(1, channels):
            xc = x_ref[pl.ds(c, nb, stride=channels), :]
            mx = jnp.maximum(mx, xc)
            sm = sm + xc.astype(jnp.float32)
        # cat([max, avg]) -> Conv2d(2,1,k=1) -> ReLU; the module's second ReLU
        # is a no-op since relu(relu(z)) == relu(z).
        att = jnp.maximum(
            w_max * mx.astype(jnp.float32) + w_avg * (sm * inv_c) + bias, 0.0
        )
        gate = jnp.repeat(att.astype(x.dtype), channels, axis=0)  # (nb*C, thw)
        o_ref[...] = (x * gate).astype(o_ref.dtype)


def _choose_tiling(n, c, hwp, itemsize, max_block_bytes):
    """Pick (nb, thw): nb batch elements per row tile (rows = nb*c), thw lanes.

    Priorities: (1) sublane-dense rows (nb*c % 8 == 0, else full row extent),
    (2) full-HW lane tiles (one contiguous HBM range per block), (3) largest
    block within max_block_bytes, (4) >= 2 grid steps so both v7x TensorCores
    get work, preferring a row split over a lane split.
    """
    lane_opts = [d for d in range(hwp, 0, -128) if hwp % d == 0]
    if not lane_opts:
        lane_opts = [hwp]
    aligned = [nb for nb in range(n, 0, -1) if n % nb == 0 and (nb * c) % 8 == 0]

    def fits(nb, thw):
        return nb * c * thw * itemsize <= max_block_bytes

    for thw in lane_opts:                       # full-HW lane tile first
        cands = [nb for nb in aligned if fits(nb, thw)]
        if not cands:
            continue
        nb = cands[0]                           # largest aligned nb that fits
        if (n // nb) * (hwp // thw) == 1:       # single grid step: try to split
            row_split = [m for m in cands if n // m >= 2]
            if row_split:
                nb = row_split[0]
            else:
                for t2 in lane_opts[1:]:        # fall back to a lane split
                    if fits(nb, t2):
                        return nb, t2
        return nb, thw

    # No sublane-aligned row tile fits the budget: use the full row extent
    # (always a legal block shape) and shrink the lane tile until it fits.
    for thw in lane_opts:
        if fits(n, thw):
            return n, thw
    return n, lane_opts[-1]


def spatial_attention_block(x_nchw, conv_w, conv_b, *, max_block_bytes=None):
    """x_nchw: (N, C, H, W). conv_w: (1, 2, 1, 1) Conv2d(2,1,k=1) weight. conv_b: (1,)."""
    N, C, H, W = x_nchw.shape
    HW = H * W
    dtype = x_nchw.dtype
    itemsize = jnp.dtype(dtype).itemsize
    MiB = 1024 * 1024

    # Generation-aware budgets: tighter on v7x (64 MiB VMEM/TC), larger on
    # v5e/v6e (128 MiB). Fall back conservatively if the query is unavailable.
    try:
        phys_vmem = int(pltpu.get_tpu_info().vmem_capacity_bytes)
    except Exception:
        phys_vmem = 64 * MiB
    small_vmem = phys_vmem <= 64 * MiB
    if max_block_bytes is None:
        max_block_bytes = (6 if small_vmem else 10) * MiB
    vmem_cap = (44 if small_vmem else 64) * MiB

    # Lane-dense spatial axis: pad HW up to a multiple of 128 if needed so
    # stores are never masked and blocks never exceed the budget.
    HWp = ((HW + 127) // 128) * 128 if HW % 128 else HW
    x2d = x_nchw.reshape(N * C, HW)
    if HWp != HW:
        x2d = jnp.pad(x2d, ((0, 0), (0, HWp - HW)))

    nb, thw = _choose_tiling(N, C, HWp, itemsize, max_block_bytes)
    rows_per_tile = nb * C
    block_bytes = rows_per_tile * thw * itemsize

    # Explicit accounting: double-buffered in + out blocks (4x) plus in-kernel
    # intermediates (gate + gated tile, ~3x block-equivalents) plus slack.
    vmem_limit = int(min(max(7 * block_bytes + 2 * MiB, 4 * MiB), vmem_cap))

    # 1x1 conv over the 2-channel concat is just two scalars + a bias.
    params = jnp.concatenate(
        [jnp.reshape(conv_w, (2,)), jnp.reshape(conv_b, (1,))]
    ).astype(jnp.float32)

    grid = (N // nb, HWp // thw)
    kernel = functools.partial(_spatial_attention_kernel, nb=nb, channels=C)

    # ~0 FLOPs/byte: tell XLA this call is bandwidth-heavy.
    cost = pl.CostEstimate(
        flops=int(N * HWp * (3 * C + 6)),
        transcendentals=0,
        bytes_accessed=int(2 * N * C * HWp * itemsize),
    )

    out2d = pl.pallas_call(
        kernel,
        out_shape=jax.ShapeDtypeStruct((N * C, HWp), dtype),
        grid_spec=pltpu.PrefetchScalarGridSpec(
            num_scalar_prefetch=1,  # conv params land in SMEM
            grid=grid,
            in_specs=[
                pl.BlockSpec((rows_per_tile, thw), lambda i, j, p: (i, j)),
            ],
            out_specs=pl.BlockSpec((rows_per_tile, thw), lambda i, j, p: (i, j)),
        ),
        compiler_params=pltpu.CompilerParams(
            dimension_semantics=("parallel", "parallel"),
            vmem_limit_bytes=vmem_limit,
        ),
        cost_estimate=cost,
    )(params, x2d)

    if HWp != HW:
        out2d = out2d[:, :HW]
    return out2d.reshape(N, C, H, W)


def reference(x, conv_w, conv_b):
    # Pure-JAX mirror of the PyTorch forward.
    mx = jnp.max(x, axis=1, keepdims=True)                  # (N, 1, H, W)
    av = jnp.mean(x, axis=1, keepdims=True)                 # (N, 1, H, W)
    att = jax.nn.relu(conv_w[0, 0, 0, 0] * mx + conv_w[0, 1, 0, 0] * av + conv_b[0])
    att = jax.nn.relu(att)                                  # second relu (no-op)
    return x * att


if __name__ == "__main__":
    key = jax.random.PRNGKey(0)
    N, C, H, W = 2, 4, 16, 16

    k_x, k_w, k_b = jax.random.split(key, 3)
    x = jax.random.normal(k_x, (N, C, H, W), dtype=jnp.float32)
    # nn.Conv2d(2, 1, kernel_size=1) parameters
    conv_w = jax.random.normal(k_w, (1, 2, 1, 1), dtype=jnp.float32) * 0.5
    conv_b = jax.random.normal(k_b, (1,), dtype=jnp.float32) * 0.1

    out = spatial_attention_block(x, conv_w, conv_b)
    out = jax.block_until_ready(out)

    ref = reference(x, conv_w, conv_b)
    assert out.shape == (N, C, H, W)
    assert jnp.allclose(out, ref, atol=1e-5, rtol=1e-5), "mismatch vs reference"

    print("KERNEL_OK")
</pallas_src>

<mosaic_0001>
module attributes {stable_mosaic.version = 11 : i64} {
  func.func @_spatial_attention_kernel(%arg0: i32, %arg1: i32, %arg2: memref<3xf32, #tpu.memory_space<smem>>, %arg3: memref<8x128xf32, #tpu.memory_space<vmem>>, %arg4: memref<8x128xf32, #tpu.memory_space<vmem>>) attributes {dimension_semantics = [#tpu.dimension_semantics<parallel>, #tpu.dimension_semantics<parallel>], iteration_bounds = array<i64: 1, 2>, scalar_prefetch = 1 : i64, scratch_operands = 0 : i64, tpu.core_type = #tpu.core_type<tc>, window_params = [{transform_indices = @transform_0, window_bounds = array<i64: 8, 128>}, {transform_indices = @transform_1, window_bounds = array<i64: 8, 128>}]} {
    %c0 = arith.constant 0 : index
    %0 = memref.load %arg2[%c0] : memref<3xf32, #tpu.memory_space<smem>>
    %c1 = arith.constant 1 : index
    %1 = memref.load %arg2[%c1] : memref<3xf32, #tpu.memory_space<smem>>
    %c2 = arith.constant 2 : index
    %2 = memref.load %arg2[%c2] : memref<3xf32, #tpu.memory_space<smem>>
    %c0_0 = arith.constant 0 : index
    %c0_1 = arith.constant 0 : index
    %3 = vector.load %arg3[%c0_0, %c0_1] : memref<8x128xf32, #tpu.memory_space<vmem>>, vector<8x128xf32>
    %c0_2 = arith.constant 0 : index
    %c0_3 = arith.constant 0 : index
    %4 = tpu.strided_load %arg3[%c0_2, %c0_3] {strides = array<i32: 4, 1>} : memref<8x128xf32, #tpu.memory_space<vmem>>, vector<2x128xf32>
    %c1_4 = arith.constant 1 : index
    %c0_5 = arith.constant 0 : index
    %5 = tpu.strided_load %arg3[%c1_4, %c0_5] {strides = array<i32: 4, 1>} : memref<8x128xf32, #tpu.memory_space<vmem>>, vector<2x128xf32>
    %6 = arith.maximumf %4, %5 : vector<2x128xf32>
    %7 = arith.addf %4, %5 : vector<2x128xf32>
    %c2_6 = arith.constant 2 : index
    %c0_7 = arith.constant 0 : index
    %8 = tpu.strided_load %arg3[%c2_6, %c0_7] {strides = array<i32: 4, 1>} : memref<8x128xf32, #tpu.memory_space<vmem>>, vector<2x128xf32>
    %9 = arith.maximumf %6, %8 : vector<2x128xf32>
    %10 = arith.addf %7, %8 : vector<2x128xf32>
    %c3 = arith.constant 3 : index
    %c0_8 = arith.constant 0 : index
    %11 = tpu.strided_load %arg3[%c3, %c0_8] {strides = array<i32: 4, 1>} : memref<8x128xf32, #tpu.memory_space<vmem>>, vector<2x128xf32>
    %12 = arith.maximumf %9, %11 : vector<2x128xf32>
    %13 = arith.addf %10, %11 : vector<2x128xf32>
    %14 = vector.broadcast %0 : f32 to vector<2x128xf32>
    %15 = arith.mulf %14, %12 : vector<2x128xf32>
    %cst = arith.constant 2.500000e-01 : f32
    %16 = vector.broadcast %cst : f32 to vector<2x128xf32>
    %17 = arith.mulf %13, %16 : vector<2x128xf32>
    %18 = vector.broadcast %1 : f32 to vector<2x128xf32>
    %19 = arith.mulf %18, %17 : vector<2x128xf32>
    %20 = arith.addf %15, %19 : vector<2x128xf32>
    %21 = vector.broadcast %2 : f32 to vector<2x128xf32>
    %22 = arith.addf %20, %21 : vector<2x128xf32>
    %cst_9 = arith.constant 0.000000e+00 : f32
    %23 = vector.broadcast %cst_9 : f32 to vector<2x128xf32>
    %24 = arith.maximumf %22, %23 : vector<2x128xf32>
    %25 = vector.shape_cast %24 : vector<2x128xf32> to vector<2x1x128xf32>
    %26 = vector.broadcast %25 : vector<2x1x128xf32> to vector<2x4x128xf32>
    %27 = vector.shape_cast %26 : vector<2x4x128xf32> to vector<8x128xf32>
    %28 = arith.mulf %3, %27 : vector<8x128xf32>
    %c0_10 = arith.constant 0 : index
    %c0_11 = arith.constant 0 : index
    %29 = vector.load %arg4[%c0_10, %c0_11] : memref<8x128xf32, #tpu.memory_space<vmem>>, vector<8x128xf32>
    tpu.vector_store %arg4[%c0_10, %c0_11], %28 {strides = array<i32>} : memref<8x128xf32, #tpu.memory_space<vmem>>, vector<8x128xf32>,
    return
  }
  func.func @transform_0(%arg0: i32, %arg1: i32, %arg2: memref<3xf32, #tpu.memory_space<smem>>) -> (i32, i32) {
    %c0_i32 = arith.constant 0 : i32
    return %arg0, %arg1 : i32, i32
  }
  func.func @transform_1(%arg0: i32, %arg1: i32, %arg2: memref<3xf32, #tpu.memory_space<smem>>) -> (i32, i32) {
    %c0_i32 = arith.constant 0 : i32
    return %arg0, %arg1 : i32, i32
  }
}

</mosaic_0001>

<bundles_post_ra>
// kernel: tpu_custom_call.1
= control target key start
LH: loop header
LB: loop body
LE: loop exit
PB: predicated region body
PF: predicated region fallthrough
CT: control target
= control target key end

     0   :  { %s516_s9 = smov [#allocation3]   ;;  %s683_s0 = inlined_call_operand.hbm [shape: f32[3], index: 0, kind: input, shape index: {}]   ;;  %s684_s1 = inlined_call_operand.hbm [shape: f32[8,256], index: 1, kind: input, shape index: {}]   ;;  %s685_s2 = inlined_call_operand.hbm [shape: f32[8,256], index: 2, kind: output, shape index: {}]  }
   0x1   :  { %8 = dma.hbm_to_smem %s683_s0, 16, %s516_s9, [#allocation2] }
   0x2   :  { %482 = dma.done.wait [#allocation2], 16 }
   0x3   :  { %483 = vsyncadd [#allocation2], 4294967280 }
   0x4   :  { %10 = sfence }
   0x5   :  { %11 = vsyncpa [#allocation5], 0 }
   0x6   :  { %13 = vsyncpa [#allocation5 + $0x1], 0 }
   0x7   :  { %14 = vsyncpa [#allocation6], 0 }
   0x8   :  { %16 = vsyncpa [#allocation6 + $0x1], 0  ;;  %s538_s12 = smov 0   ;;  %s540_s13 = smov 0  }
   0x9   :  { %s542_s14 = smov 0   ;;  %s544_s15 = smov 0  }
   0xa   :  { %s546_s16 = smov 0   ;;  %s548_s17 = smov 0  }
   0xb LB: > { %s314_s0 = sadd.s32 4294967295, %s514_s17   ;;  %s315_s18 = sadd.s32 4294967294, %s514_s17   ;;  %s514_s17 = sphi %s548_s17, %s22_s17   ;;  %s510_s16 = sphi %s546_s16, %s697_s16   ;;  %s506_s15 = sphi %s544_s15, %s696_s15   ;;  %s502_s14 = sphi %s542_s14, %s695_s14   ;;  %s498_s13 = sphi %s540_s13, %s694_s13   ;;  %s494_s12 = sphi %s538_s12, %s693_s12  }
   0xc   : > { %s31_s19 = sadd.s32 1, %s510_s16  ;;  %s43_s20 = sadd.s32 1, %s502_s14 }
   0xd   : > { %p32_p0 = scmp.ge.s32.totalorder %s31_s19, 2  ;;  %p50_p1 = scmp.ne.s32.totalorder %s502_s14, %s498_s13 }
   0xe   : > { %p51_p2 = scmp.eq.s32.totalorder %s514_s17, 0  ;;  %p56_p3 = scmp.ne.s32.totalorder %s498_s13, %s494_s12 }
   0xf   : > { %s699_s19 = smov (%p32_p0, %s31_s19), 0  ;;  %p57_p5 = scmp.eq.s32.totalorder %s314_s0, 0 }
  0x10   : > { %p579_p4 = por %p51_p2, %p50_p1  ;;  %s39_s22 = ssub.s32 %s510_s16, %s699_s19 }
  0x11   : > { %p82_p6 = scmp.eq.s32.totalorder %s314_s0, 1  ;;  %p41_p7 = scmp.eq.s32.totalorder %s39_s22, 0 }
  0x12   : > { %p585_p8 = por %p57_p5, %p56_p3  ;;  %p88_p10 = scmp.eq.s32.totalorder %s315_s18, 1 }
  0x13   : > { %p589_p9 = por %p82_p6, %p50_p1  ;;  %p344_p13 = scmp.lt.s32.totalorder %s514_s17, 2 }
  0x14   : > { %s594_s25 = scalar_select %p41_p7, %s502_s14, %s43_s20  }
  0x15   : > { %p596_p11 = por %p88_p10, %p56_p3  ;;  %s108_s27 = sand.u32 1, %s502_s14  }
  0x16   : > { %s318_s28 = sshll.u32 %s108_s27, 3  ;;  %s319_s29 = sshll.u32 %s510_s16, 7 }
  0x17   : > { %s689_s26 = scalar_select %p596_p11, 1, 0 }
  0x18   : > { %s119_s4 = scalar_lea.hbm %s684_s1, %s319_s29  ;;  %s112_s5 = scalar_lea.vmem [#allocation4], %s318_s28 }
  0x19   : > { %s121_s6 = sshll.u32 %s112_s5, 4  ;;  %p609_p0 = pnand %p344_p13, %p579_p4  ;;  %s122_s6 = int_to_ptr.vmem [resolvable:$true] %s121_s6 }
  0x1a   : > { %p320_p1 = scmp.ge.s32.totalorder %s514_s17, 1  ;;  %p126_p2 = scmp.lt.s32.totalorder %s514_s17, 3 }
  0x1b   : > { %s109_s8 = scalar_lea.sflag [#allocation5], %s108_s27  ;;  %p406_p3 = pneg %p609_p0 }
  0x1c   : > { %s417_s9 = scalar_lea.vmem %s122_s6, 128  ;;  %s517_s10 = smov [#allocation4]  }
  0x1d   : > { %p418_p5 = scmp.ne.s32.totalorder %s122_s6, %s417_s9  ;;  %s422_s11 = sshll.u32 %s517_s10, 4  ;;  %s423_s11 = int_to_ptr.vmem [resolvable:$false] %s422_s11 }
  0x1e   : > { %s424_s0 = scalar_lea.vmem %s423_s11, 256  ;;  %p425_p10 = scmp.lt.s32.totalorder %s122_s6, %s423_s11 }
  0x1f   : > { %p420_p6 = pnand %p418_p5, %p406_p3  ;;  %p426_p12 = scmp.lt.s32.totalorder %s424_s0, %s417_s9 }
  0x21   : > { %p421_p7 = pneg %p420_p6  ;;  %p427_p4 = por %p426_p12, %p425_p10 }
  0x23   : > { %p428_p13 = pnand %p427_p4, %p421_p7 }
  0x25   : > { %431 = shalt.err (!%p428_p13)
}
  0x26   : > { %339 = dma.hbm_to_vmem [thread:$0]  (!%p609_p0), %s119_s4, 128, %s122_s6, %s109_s8  }
  0x27   : > { %p127_p11 = pnand %p320_p1, %p126_p2 }
  0x28   : > { %s624_s18 = sand.u32 (!%p127_p11), 1, %s498_s13  }
  0x29   : > { %130 = sbr.rel (%p127_p11) target bundleno = 90 (0x5a), region = 24  ;;  %s321_s20 = sshll.u32 (!%p127_p11), %s624_s18, 3 }
  0x2a   : > { %s133_s21 = scalar_lea.sflag (!%p127_p11), [#allocation5], %s624_s18  ;;  %s630_s22 = scalar_lea.vmem (!%p127_p11), [#allocation4], %s321_s20 }
  0x2e   : > { %485 = dma.done.wait (%p585_p8), %s133_s21, 128  }
  0x2f   : > { %487 = vsyncadd (%p585_p8), %s133_s21, 4294967168  ;;  %s155_s27 = sld [smem:[#allocation3]]  ;;  %v159_v0 = vld [vmem:[%s630_s22] ss:$4 sm:$0x3]  ;;  %v185_v13 = vlaneseq  ;;  %s154_s23 = scalar_lea.vmem [#allocation7], %s321_s20 }
  0x30   : > { %s323_s28 = sld [smem:[#allocation3 + $0x1]]  ;;  %v325_v1 = vld [vmem:[%s630_s22 + $0x1] ss:$4 sm:$0x3]  ;;  %v518_v11 = vmov 1966171168  }
  0x31   : > { %v326_v2 = vld [vmem:[%s630_s22 + $0x2] ss:$4 sm:$0x3]  ;;  %v162_v3 = vmax.f32 %v159_v0, %v325_v1  ;;  %v163_v4 = vadd.f32 %v325_v1, %v159_v0  ;;  %s324_s29 = sld [smem:[#allocation3 + $0x2]]  ;;  %v183_v12 = vunpack.c.l.s4 %v518_v11  ;;  %v186_v19 = vshrl.u32 %v185_v13, 7  ;;  %s232_s30 = sshll.u32 %s154_s23, 4  ;;  %s233_s30 = int_to_ptr.vmem [resolvable:$true] %s232_s30 }
  0x32   : > { %v327_v5 = vld [vmem:[%s630_s22 + $0x3] ss:$4 sm:$0x3]  ;;  %s329_s3 = sshll.u32 %s506_s15, 7  ;;  %s217_s7 = scalar_lea.sflag [#allocation6], %s624_s18 }
  0x33   : > { %v166_v6 = vmax.f32 %v162_v3, %v326_v2  ;;  %v167_v7 = vadd.f32 %v326_v2, %v163_v4  ;;  %v184_v18 = vunpack.c.0.s8 %v183_v12  ;;  %v206_v26 = vsub.s32 0, %v186_v19  ;;  %v158_v32 = vld [vmem:[%s630_s22] sm:$0xff]  ;;  %s230_s6 = scalar_lea.hbm %s685_s2, %s329_s3  ;;  %s432_s8 = scalar_lea.vmem %s233_s30, 128 }
  0x34   : > { %p433_p8 = scmp.ne.s32.totalorder %s233_s30, %s432_s8  ;;  %s519_s9 = smov [#allocation7]  }
  0x35   : > { %v172_v8 = vstv %s155_s27  ;;  %v170_v9 = vmax.f32 %v166_v6, %v327_v5  ;;  %v171_v10 = vadd.f32 %v327_v5, %v167_v7  ;;  %v187_v23 = vsub.s32 %v184_v18, %v186_v19  ;;  %s436_s10 = sshll.u32 %s519_s9, 4  ;;  %s437_s10 = int_to_ptr.vmem [resolvable:$false] %s436_s10 }
  0x36   : > { %v175_v14 = vstv %s323_s28  ;;  %p434_p11 = pnand %p433_p8, %p589_p9  ;;  %s438_s11 = scalar_lea.vmem %s437_s10, 256 }
  0x37   : > { %v173_v15 = vmul.f32 %v172_v8, %v170_v9  ;;  %v174_v16 = vmul.f32 0.25, %v171_v10  ;;  %v178_v20 = vstv %s324_s29  ;;  %p439_p0 = scmp.lt.s32.totalorder %s233_s30, %s437_s10  ;;  %p440_p1 = scmp.lt.s32.totalorder %s438_s11, %s432_s8 }
  0x38   : > { %p435_p12 = pneg %p434_p11 }
  0x39   : > { %v176_v17 = vmul.f32 %v175_v14, %v174_v16  ;;  %p441_p2 = por %p440_p1, %p439_p0 }
  0x3b   : > { %v177_v21 = vadd.f32 %v176_v17, %v173_v15  ;;  %p442_p3 = pnand %p441_p2, %p435_p12 }
  0x3d   : > { %v179_v22 = vadd.f32 %v178_v20, %v177_v21 }
  0x3f   : > { %v180_v24 = vmax.f32 %v179_v22, 0.0 }
  0x41   : > { %v188_v25 = vrot.slane %v180_v24, %v187_v23 }
  0x43   : > { %v189_v27 = vcombine.high %v188_v25, %v188_v25  ;;  %v196_v28 = vrot.slane %v188_v25, %v187_v23 }
  0x45   : > { %v203_v29 = vrot.slane %v189_v27, %v187_v23  ;;  %v207_v30 = vrot.slane %v196_v28, %v206_v26 }
  0x47   : > { %v211_v31 = vrot.slane %v203_v29, %v206_v26 }
  0x49   : > { %v212_v33 = vcombine.low %v207_v30, %v211_v31 }
  0x4b   : > { %v214_v34 = vmul.f32 %v212_v33, %v158_v32 }
  0x4d   : > { %215 = vst [vmem:[%s154_s23] sm:$0xff] %v214_v34 }
  0x4e   : > { %445 = shalt.err (!%p442_p3)
}
  0x4f   : > { %s446_s15 = scalar_lea.hbm %s230_s6, 128  ;;  %s450_s20 = scalar_lea.hbm %s685_s2, 256 }
  0x50   : > { %p447_p5 = scmp.ne.s32.totalorder %s230_s6, %s446_s15  ;;  %p451_p10 = scmp.lt.s32.totalorder %s230_s6, %s685_s2 }
  0x51   : > { %p452_p4 = scmp.lt.s32.totalorder %s450_s20, %s446_s15 }
  0x52   : > { %p448_p6 = pnand %p447_p5, %p589_p9 }
  0x53   : > { %p453_p13 = por %p452_p4, %p451_p10 }
  0x54   : > { %p449_p7 = pneg %p448_p6 }
  0x56   : > { %p454_p8 = pnand %p453_p13, %p449_p7 }
  0x58   : > { %457 = shalt.err (!%p454_p8)
}
  0x59   : > { %334 = dma.vmem_to_hbm [thread:$0]  (%p589_p9), %s233_s30, 128, %s230_s6, %s217_s7  }
  0x5a PF: > { %s244_s27 = sand.u32 1, %s494_s12   ;;  %p691_p11 = scmp.ne.s32.totalorder %s689_s26, 0 }
  0x5b   : > { %p692_p12 = scmp.ge.s32.totalorder %s514_s17, 2  ;;  %s245_s28 = scalar_lea.sflag [#allocation6], %s244_s27 }
  0x5d   : > { %p341_p0 = pnand %p692_p12, %p691_p11 }
  0x5f   : > { %p342_p1 = pneg %p341_p0 }
  0x61   : > { %489 = dma.done.wait (%p342_p1), %s245_s28, 128  }
  0x62   : > { %491 = vsyncadd (%p342_p1), %s245_s28, 4294967168  ;;  %s22_s17 = sadd.s32 1, %s514_s17   ;;  %s693_s12 = smov %s498_s13 }
  0x63   : > { %p19_p2 = scmp.ge.s32.totalorder %s22_s17, 4   ;;  %s694_s13 = smov %s502_s14 }
  0x64   : > { %s695_s14 = smov %s594_s25  ;;  %s696_s15 = smov %s510_s16 }
  0x65   : > { %s697_s16 = smov %s699_s19  ;;  %21 = sbr.rel (!%p19_p2) target bundleno = 11 (0xb), region = 72 }
  0x6a   :  { %250 = vsyncpa [#allocation5], 1 }
  0x6b   :  { %252 = vsyncpa [#allocation5 + $0x1], 1 }
  0x6c   :  { %253 = vsyncpa [#allocation6], 1 }
  0x6d   :  { %255 = vsyncpa [#allocation6 + $0x1], 1 }

</bundles_post_ra>
